<compile_context>
chip_gen: v7x
topology: tpu7x:2x2x1
jax: 0.10.0
libtpu: 0.0.40
codegen_flags: <defaults>
</compile_context>

<pallas_src>
import math

import jax
import jax.numpy as jnp
from jax.experimental import pallas as pl
from jax.experimental.pallas import tpu as pltpu


def _round_up(x, m):
    return ((x + m - 1) // m) * m


def policy_mlp_kernel(x_ref, w1_ref, b1_ref, w2_ref, b2_ref, o_ref):
    # fc1: bf16 MXU inputs, f32 accumulation, f32 elementwise tail.
    x = x_ref[...].astype(jnp.bfloat16)
    h = jnp.dot(x, w1_ref[...], preferred_element_type=jnp.float32)
    h = jnp.maximum(h + b1_ref[...], 0.0)

    # fc2: (TM, H) @ (H, A) -> (TM, A).  A is the full (unpadded) action dim.
    logits = jnp.dot(h.astype(jnp.bfloat16), w2_ref[...],
                     preferred_element_type=jnp.float32)
    logits = logits + b2_ref[...]

    # Numerically-stable softmax over the action dim, exact normalization.
    m = jnp.max(logits, axis=-1, keepdims=True)
    e = jnp.exp(logits - m)
    denom = jnp.sum(e, axis=-1, keepdims=True)
    o_ref[...] = (e / denom).astype(o_ref.dtype)


def prepare_policy_params(w1, b1, w2, b2):
    """One-time parameter prep (hoisted out of the forward): bf16 weights, f32 row biases."""
    return (w1.astype(jnp.bfloat16),
            jnp.asarray(b1, jnp.float32).reshape(1, -1),
            w2.astype(jnp.bfloat16),
            jnp.asarray(b2, jnp.float32).reshape(1, -1))


def _choose_tile(B, tile_m):
    # Biggest batch tile (multiple of 8 sublanes) <= tile_m, capped at ~B/2 when B is large
    # enough so the "parallel" batch grid has >= 2 steps (keeps both v7x TensorCores busy).
    tm = min(tile_m, _round_up(max(B, 1), 8))
    if B >= 16:
        tm = min(tm, _round_up(pl.cdiv(B, 2), 8))
    return max(_round_up(tm, 8), 8)


def policy_network_forward(x, params, *, tile_m=2048):
    """x: [B, obs] f32; params from prepare_policy_params -> [B, act] f32 probabilities."""
    w1p, b1p, w2p, b2p = params
    B, K = x.shape
    H = w1p.shape[1]
    A = w2p.shape[1]

    TM = _choose_tile(B, tile_m)
    # Ragged last block is fine: Pallas DMAs only the in-bounds sub-rectangle; garbage rows in
    # the tail tile are per-row independent and never written back to HBM.
    grid = (pl.cdiv(B, TM),)

    const = lambda shape: pl.BlockSpec(shape, lambda i: (0, 0))

    cost = pl.CostEstimate(
        flops=2 * B * (K * H + H * A),
        transcendentals=B * A,
        bytes_accessed=(B * K * 4 + K * H * 2 + H * 4 + H * A * 2 + A * 4 + B * A * 4),
    )

    return pl.pallas_call(
        policy_mlp_kernel,
        out_shape=jax.ShapeDtypeStruct((B, A), jnp.float32),
        grid=grid,
        in_specs=[
            pl.BlockSpec((TM, K), lambda i: (i, 0)),   # x: streamed per batch tile
            const((K, H)),                             # weights / biases: resident in VMEM
            const((1, H)),
            const((H, A)),
            const((1, A)),
        ],
        out_specs=pl.BlockSpec((TM, A), lambda i: (i, 0)),  # unpadded, lane dim == full array dim
        compiler_params=pltpu.CompilerParams(
            dimension_semantics=("parallel",)),
        cost_estimate=cost,
    )(x, w1p, b1p, w2p, b2p)


def init_policy_params(key, obs_space, hidden, action_space):
    """Deterministic init mimicking PyTorch nn.Linear default (uniform +/- 1/sqrt(fan_in))."""
    k1, k2, k3, k4 = jax.random.split(key, 4)
    bound1 = 1.0 / math.sqrt(obs_space)
    bound2 = 1.0 / math.sqrt(hidden)
    w1 = jax.random.uniform(k1, (obs_space, hidden), jnp.float32, -bound1, bound1)
    b1 = jax.random.uniform(k2, (hidden,), jnp.float32, -bound1, bound1)
    w2 = jax.random.uniform(k3, (hidden, action_space), jnp.float32, -bound2, bound2)
    b2 = jax.random.uniform(k4, (action_space,), jnp.float32, -bound2, bound2)
    return w1, b1, w2, b2


def _reference(x, w1, b1, w2, b2):
    # Same bf16-in / f32-accumulate precision path as the kernel, exact softmax.
    h = jnp.dot(x.astype(jnp.bfloat16), w1.astype(jnp.bfloat16),
                preferred_element_type=jnp.float32) + b1.reshape(1, -1)
    h = jnp.maximum(h, 0.0)
    logits = jnp.dot(h.astype(jnp.bfloat16), w2.astype(jnp.bfloat16),
                     preferred_element_type=jnp.float32) + b2.reshape(1, -1)
    return jax.nn.softmax(logits, axis=-1)


if __name__ == "__main__":
    key = jax.random.PRNGKey(0)
    obs_space, hidden, action_space = 32, 128, 8

    k_params, k_x1, k_x2 = jax.random.split(key, 3)
    w1, b1, w2, b2 = init_policy_params(k_params, obs_space, hidden, action_space)
    params = prepare_policy_params(w1, b1, w2, b2)   # hoisted one-time prep

    ok = True

    # Small batch (single grid step).
    x_small = jax.random.normal(k_x1, (8, obs_space), jnp.float32)
    out_small = policy_network_forward(x_small, params)
    jax.block_until_ready(out_small)
    ref_small = _reference(x_small, w1, b1, w2, b2)
    ok &= out_small.shape == (8, action_space)
    ok &= bool(jnp.allclose(jnp.sum(out_small, axis=-1), 1.0, atol=5e-3))
    ok &= bool(jnp.allclose(out_small, ref_small, atol=5e-3))

    # Larger batch, not a multiple of the tile: 2 grid steps (megacore-friendly) with a
    # ragged last block — no wrapper padding or output slicing.
    x_big = jax.random.normal(k_x2, (300, obs_space), jnp.float32)
    out_big = policy_network_forward(x_big, params)
    jax.block_until_ready(out_big)
    ref_big = _reference(x_big, w1, b1, w2, b2)
    ok &= out_big.shape == (300, action_space)
    ok &= bool(jnp.allclose(jnp.sum(out_big, axis=-1), 1.0, atol=5e-3))
    ok &= bool(jnp.allclose(out_big, ref_big, atol=5e-3))

    assert ok
    print("KERNEL_OK")
</pallas_src>

<mosaic_0001>
module attributes {stable_mosaic.version = 11 : i64} {
  func.func @policy_mlp_kernel(%arg0: i32, %arg1: memref<8x32xf32, #tpu.memory_space<vmem>>, %arg2: memref<32x128xbf16, #tpu.memory_space<vmem>>, %arg3: memref<1x128xf32, #tpu.memory_space<vmem>>, %arg4: memref<128x8xbf16, #tpu.memory_space<vmem>>, %arg5: memref<1x8xf32, #tpu.memory_space<vmem>>, %arg6: memref<8x8xf32, #tpu.memory_space<vmem>>) attributes {dimension_semantics = [#tpu.dimension_semantics<parallel>], iteration_bounds = array<i64: 1>, scalar_prefetch = 0 : i64, scratch_operands = 0 : i64, tpu.core_type = #tpu.core_type<tc>, window_params = [{transform_indices = @transform_0, window_bounds = array<i64: 8, 32>}, {pipeline_mode = #tpu.pipeline_mode<synchronous>, transform_indices = @transform_1, window_bounds = array<i64: 32, 128>}, {pipeline_mode = #tpu.pipeline_mode<synchronous>, transform_indices = @transform_2, window_bounds = array<i64: 1, 128>}, {pipeline_mode = #tpu.pipeline_mode<synchronous>, transform_indices = @transform_3, window_bounds = array<i64: 128, 8>}, {pipeline_mode = #tpu.pipeline_mode<synchronous>, transform_indices = @transform_4, window_bounds = array<i64: 1, 8>}, {transform_indices = @transform_5, window_bounds = array<i64: 8, 8>}]} {
    %c0 = arith.constant 0 : index
    %c0_0 = arith.constant 0 : index
    %0 = vector.load %arg1[%c0, %c0_0] : memref<8x32xf32, #tpu.memory_space<vmem>>, vector<8x32xf32>
    %1 = arith.truncf %0 : vector<8x32xf32> to vector<8x32xbf16>
    %c0_1 = arith.constant 0 : index
    %c0_2 = arith.constant 0 : index
    %2 = vector.load %arg2[%c0_1, %c0_2] : memref<32x128xbf16, #tpu.memory_space<vmem>>, vector<32x128xbf16>
    %cst = arith.constant dense<0.000000e+00> : vector<8x128xf32>
    %3 = tpu.matmul %1, %2, %cst {dimension_numbers = #tpu.dot_dimension_numbers<[1], [0], [0], [1], [0, 0, 1, 1], [], []>} : vector<8x32xbf16>, vector<32x128xbf16>, vector<8x128xf32> -> vector<8x128xf32>
    %c0_3 = arith.constant 0 : index
    %c0_4 = arith.constant 0 : index
    %4 = vector.load %arg3[%c0_3, %c0_4] : memref<1x128xf32, #tpu.memory_space<vmem>>, vector<1x128xf32>
    %5 = vector.broadcast %4 : vector<1x128xf32> to vector<8x128xf32>
    %6 = arith.addf %3, %5 : vector<8x128xf32>
    %cst_5 = arith.constant 0.000000e+00 : f32
    %7 = vector.broadcast %cst_5 : f32 to vector<8x128xf32>
    %8 = arith.maximumf %6, %7 : vector<8x128xf32>
    %9 = arith.truncf %8 : vector<8x128xf32> to vector<8x128xbf16>
    %c0_6 = arith.constant 0 : index
    %c0_7 = arith.constant 0 : index
    %10 = vector.load %arg4[%c0_6, %c0_7] : memref<128x8xbf16, #tpu.memory_space<vmem>>, vector<128x8xbf16>
    %cst_8 = arith.constant dense<0.000000e+00> : vector<8x8xf32>
    %11 = tpu.matmul %9, %10, %cst_8 {dimension_numbers = #tpu.dot_dimension_numbers<[1], [0], [0], [1], [0, 0, 1, 1], [], []>} : vector<8x128xbf16>, vector<128x8xbf16>, vector<8x8xf32> -> vector<8x8xf32>
    %c0_9 = arith.constant 0 : index
    %c0_10 = arith.constant 0 : index
    %12 = vector.load %arg5[%c0_9, %c0_10] : memref<1x8xf32, #tpu.memory_space<vmem>>, vector<1x8xf32>
    %13 = vector.broadcast %12 : vector<1x8xf32> to vector<8x8xf32>
    %14 = arith.addf %11, %13 : vector<8x8xf32>
    %cst_11 = arith.constant dense<0xFF800000> : vector<8xf32>
    %15 = vector.multi_reduction <maximumf>, %14, %cst_11 [1] : vector<8x8xf32> to vector<8xf32>
    %16 = vector.shape_cast %15 : vector<8xf32> to vector<8x1xf32>
    %17 = vector.broadcast %16 : vector<8x1xf32> to vector<8x8xf32>
    %18 = arith.subf %14, %17 : vector<8x8xf32>
    %19 = math.exp %18 : vector<8x8xf32>
    %cst_12 = arith.constant dense<0.000000e+00> : vector<8xf32>
    %20 = vector.multi_reduction <add>, %19, %cst_12 [1] : vector<8x8xf32> to vector<8xf32>
    %21 = vector.shape_cast %20 : vector<8xf32> to vector<8x1xf32>
    %22 = vector.broadcast %21 : vector<8x1xf32> to vector<8x8xf32>
    %23 = arith.divf %19, %22 : vector<8x8xf32>
    %c0_13 = arith.constant 0 : index
    %c0_14 = arith.constant 0 : index
    %24 = vector.load %arg6[%c0_13, %c0_14] : memref<8x8xf32, #tpu.memory_space<vmem>>, vector<8x8xf32>
    tpu.vector_store %arg6[%c0_13, %c0_14], %23 {strides = array<i32>} : memref<8x8xf32, #tpu.memory_space<vmem>>, vector<8x8xf32>,
    return
  }
  func.func @transform_0(%arg0: i32) -> (i32, i32) {
    %c0_i32 = arith.constant 0 : i32
    %c0_i32_0 = arith.constant 0 : i32
    return %arg0, %c0_i32 : i32, i32
  }
  func.func @transform_1(%arg0: i32) -> (i32, i32) {
    %c0_i32 = arith.constant 0 : i32
    %c0_i32_0 = arith.constant 0 : i32
    %c0_i32_1 = arith.constant 0 : i32
    return %c0_i32, %c0_i32_0 : i32, i32
  }
  func.func @transform_2(%arg0: i32) -> (i32, i32) {
    %c0_i32 = arith.constant 0 : i32
    %c0_i32_0 = arith.constant 0 : i32
    %c0_i32_1 = arith.constant 0 : i32
    return %c0_i32, %c0_i32_0 : i32, i32
  }
  func.func @transform_3(%arg0: i32) -> (i32, i32) {
    %c0_i32 = arith.constant 0 : i32
    %c0_i32_0 = arith.constant 0 : i32
    %c0_i32_1 = arith.constant 0 : i32
    return %c0_i32, %c0_i32_0 : i32, i32
  }
  func.func @transform_4(%arg0: i32) -> (i32, i32) {
    %c0_i32 = arith.constant 0 : i32
    %c0_i32_0 = arith.constant 0 : i32
    %c0_i32_1 = arith.constant 0 : i32
    return %c0_i32, %c0_i32_0 : i32, i32
  }
  func.func @transform_5(%arg0: i32) -> (i32, i32) {
    %c0_i32 = arith.constant 0 : i32
    %c0_i32_0 = arith.constant 0 : i32
    return %arg0, %c0_i32 : i32, i32
  }
}

</mosaic_0001>

<bundles_post_ra>
// kernel: tpu_custom_call.1
= control target key start
LH: loop header
LB: loop body
LE: loop exit
PB: predicated region body
PF: predicated region fallthrough
CT: control target
= control target key end

     0   :  { %v325_v1 = vmov 0.0   ;;  %vm326_vm0 = vmmov 0   ;;  %vm47_vm1 = vcmask 261120   ;;  %s412_s0 = inlined_call_operand.vmem [shape: f32[8,32], index: 0, kind: input, shape index: {}]   ;;  %s413_s1 = inlined_call_operand.vmem [shape: bf16[32,128], index: 1, kind: input, shape index: {}]   ;;  %s414_s2 = inlined_call_operand.vmem [shape: f32[1,128], index: 2, kind: input, shape index: {}]   ;;  %s415_s3 = inlined_call_operand.vmem [shape: bf16[128,8], index: 3, kind: input, shape index: {}]   ;;  %s416_s4 = inlined_call_operand.vmem [shape: f32[1,8], index: 4, kind: input, shape index: {}]   ;;  %s417_s5 = inlined_call_operand.hbm [shape: f32[8,8], index: 5, kind: output, shape index: {}]  }
   0x1   :  { %v287_v0 = vld [vmem:[%s413_s1] sm:$0xff]   ;;  %256 = vmatprep.subr.bf16.mxu0 %v325_v1  ;;  %v288_v2 = vld [vmem:[%s413_s1 + $0x8] sm:$0xff]   ;;  %264 = vmatprep.subr.bf16.mxu1 %v325_v1  ;;  %v291_v7 = vld [vmem:[%s415_s3 + $0x10] sm:$0xff]  }
   0x2   :  { %257 = vmatpush3.bf16.msra.mxu0 %v287_v0  ;;  %260 = vmatprep.mubr.msk.bf16.mxu0 %vm326_vm0, %v325_v1  ;;  %v22_v3 = vld [vmem:[%s412_s0] sm:$0xff]  ;;  %v290_v6 = vld [vmem:[%s415_s3 + $0x8] sm:$0xff]  }
   0x3   :  { %258 = vmatprep.subr.bf16.mxu0 %v325_v1  ;;  %v289_v4 = vld [vmem:[%s415_s3] sm:$0xff]   ;;  %280 = vmatprep.mubr.msk.bf16.mxu1 %vm326_vm0, %v325_v1  ;;  %v23_v5 = vpack.c.bf16 %v22_v3, %v22_v3 }
   0x4   :  { %265 = vmatpush3.bf16.msra.mxu1 %v289_v4 }
   0x5   :  { %266 = vmatprep.subr.bf16.mxu1 %v325_v1 }
   0x6   :  { %259 = vmatpush3.bf16.msra.mxu0 %v288_v2 }
   0x8   :  { %267 = vmatpush3.bf16.msra.mxu1 %v290_v6 }
   0x9   :  { %261 = vmatmul.mubr.msk.bf16.vlgmr.msra.gmra.mrb[0].mxu0 %vm47_vm1, %v23_v5  ;;  %268 = vmatprep.subr.bf16.mxu1 %v325_v1 }
   0xa   :  { %10 = vsyncpa [#allocation3], 0  ;;  %v292_v8 = vld [vmem:[%s415_s3 + $0x18] sm:$0xff]   ;;  %v293_v9 = vld [vmem:[%s415_s3 + $0x20] sm:$0xff]   ;;  %vm204_vm2 = vcmask 64512  }
   0xb   :  { %v294_v10 = vld [vmem:[%s415_s3 + $0x28] sm:$0xff]   ;;  %v295_v11 = vld [vmem:[%s415_s3 + $0x30] sm:$0xff]   ;;  %v296_v12 = vld [vmem:[%s415_s3 + $0x38] sm:$0xff]  }
   0xc   :  { %269 = vmatpush3.bf16.msra.mxu1 %v291_v7  ;;  %v231_v13 = vld [vmem:[%s414_s2] ss:$0 sm:$0xff]  ;;  %s327_s2 = smov [#allocation2]  }
   0xd   :  { %270 = vmatprep.subr.bf16.mxu1 %v325_v1  ;;  %v235_v21 = vld [vmem:[%s416_s4] ss:$0 sm:$0xff]  ;;  %s223_s3 = sshll.u32 %s327_s2, 4  ;;  %s224_s3 = int_to_ptr.vmem [resolvable:$true] %s223_s3 }
   0xe   :  { %s301_s4 = scalar_lea.vmem %s224_s3, 128  ;;  %p306_p1 = scmp.lt.s32.totalorder %s224_s3, %s224_s3 }
   0xf   :  { %p302_p0 = scmp.ne.s32.totalorder %s224_s3, %s301_s4  ;;  %p307_p2 = scmp.lt.s32.totalorder %s301_s4, %s301_s4 }
  0x10   :  { %271 = vmatpush3.bf16.msra.mxu1 %v292_v8 }
  0x11   :  { %272 = vmatprep.subr.bf16.mxu1 %v325_v1  ;;  %p308_p3 = por %p307_p2, %p306_p1 }
  0x13   :  { %p309_p4 = pnand %p308_p3, %p302_p0 }
  0x14   :  { %273 = vmatpush3.bf16.msra.mxu1 %v293_v9 }
  0x15   :  { %274 = vmatprep.subr.bf16.mxu1 %v325_v1 }
  0x18   :  { %275 = vmatpush3.bf16.msra.mxu1 %v294_v10 }
  0x19   :  { %276 = vmatprep.subr.bf16.mxu1 %v325_v1 }
  0x1c   :  { %277 = vmatpush3.bf16.msra.mxu1 %v295_v11 }
  0x1d   :  { %278 = vmatprep.subr.bf16.mxu1 %v325_v1 }
  0x20   :  { %279 = vmatpush3.bf16.msra.mxu1 %v296_v12 }
  0xdc   :  { %v85_v14 = vpop.f32.mrb[0].mxu0 }
  0xdd   :  { %v86_v15 = vadd.f32 %v231_v13, %v85_v14  ;;  %v262_v16 = vpop.f32.mrb[1].mxu0 }
  0xde   :  { %v88_v17 = vpop.f32.mrb[2].mxu0 }
  0xdf   :  { %v91_v18 = vmax.f32 %v86_v15, 0.0  ;;  %v263_v19 = vpop.f32.mrb[3].mxu0 }
  0xe1   :  { %v92_v20 = vpack.c.bf16 %v91_v18, %v91_v18 }
  0xe3   :  { %281 = vmatmul.mubr.bf16.vlgmr.msra.gmra.mrb[0].mxu1 %v92_v20 }
 0x1b6   :  { %v198_v22 = vpop.f32.mrb[0].mxu1 }
 0x1b7   :  { %v199_v23 = vadd.f32 %v235_v21, %v198_v22  ;;  %v282_v24 = vpop.f32.mrb[1].mxu1 }
 0x1b8   :  { %v201_v25 = vpop.f32.mrb[2].mxu1 }
 0x1b9   :  { %v283_v26 = vpop.f32.mrb[3].mxu1  ;;  %v205_v27 = vsel %vm204_vm2, %v199_v23, -inf }
 0x1ba   :  { %206 = vmax.xlane.f32.xlu0 %v205_v27 }
 0x247   :  { %v207_v28 = vpop.xlane.xlu0 %206 }
 0x248   :  { %v208_v29 = vsub.f32 %v199_v23, %v207_v28 }
 0x24a   :  { %v209_v30 = vmul.f32 1.442695, %v208_v29 }
 0x24c   :  { %297 = vpow2.f32 %v209_v30 }
 0x256   :  { %v298_v31 = vpop.eup %297 }
 0x257   :  { %v211_v32 = vsel %vm204_vm2, %v298_v31, 0.0 }
 0x258   :  { %212 = vadd.xlane.f32.xlu0 %v211_v32 }
 0x2e5   :  { %v213_v33 = vpop.xlane.xlu0 %212 }
 0x2e6   :  { %299 = vrcp.f32 %v213_v33 }
 0x2f0   :  { %v300_v34 = vpop.eup %299 }
 0x2f1   :  { %v215_v35 = vmul.f32 %v300_v34, %v298_v31 }
 0x2f3   :  { %216 = vst.msk [vmem:[#allocation2] sm:$0xff] %vm204_vm2, %v215_v35 }
 0x2f4   :  { %312 = shalt.err (!%p309_p4)
}
 0x2f5   :  { %s313_s19 = scalar_lea.hbm %s417_s5, 128 }
 0x2f6   :  { %p314_p5 = scmp.ne.s32.totalorder %s417_s5, %s313_s19  ;;  %p317_p6 = scmp.lt.u32.totalorder %s313_s19, %s417_s5 }
 0x2f8   :  { %p319_p7 = pnand %p317_p6, %p314_p5 }
 0x2fa   :  { %322 = shalt.err (!%p319_p7)
}
 0x2fb   :  { %226 = dma.vmem_to_hbm [thread:$0]  %s224_s3, 128, %s417_s5, [#allocation3]  }
 0x2fc   :  { %323 = dma.done.wait [#allocation3], 128  }
 0x2fd   :  { %324 = vsyncadd [#allocation3], 4294967168 }
 0x2fe   :  { %230 = vsyncpa [#allocation3], 1 }

</bundles_post_ra>
